<compile_context>
chip_gen: v6e
topology: v6e:2x2x1
jax: 0.10.0
libtpu: 0.0.40
codegen_flags: <defaults>
</compile_context>

<pallas_src>
import functools

import jax
import jax.numpy as jnp
import numpy as np
from jax.experimental import pallas as pl
from jax.experimental.pallas import tpu as pltpu


# ----------------------------------------------------------------------------
# Plain-JAX glue: bilinear (align_corners=True) interpolation of weight / PE.
# The torch weight/pe always has one spatial dim of size 1, so per-axis linear
# interpolation is exactly F.interpolate(..., 'bilinear', align_corners=True).
# ----------------------------------------------------------------------------
def _linear_interp_align_corners(arr, axis, out_size):
    in_size = arr.shape[axis]
    if in_size == out_size:
        return arr
    if out_size == 1:
        pos = jnp.zeros((1,), jnp.float32)
    else:
        pos = jnp.arange(out_size, dtype=jnp.float32) * ((in_size - 1) / (out_size - 1))
    i0 = jnp.floor(pos).astype(jnp.int32)
    i1 = jnp.minimum(i0 + 1, in_size - 1)
    frac = pos - i0.astype(jnp.float32)
    a0 = jnp.take(arr, i0, axis=axis)
    a1 = jnp.take(arr, i1, axis=axis)
    bshape = [1] * arr.ndim
    bshape[axis] = out_size
    frac = frac.reshape(bshape)
    return a0 * (1.0 - frac) + a1 * frac


def _prepare_params(weight, pe, conv_type, H, W, dtype, use_pe=True,
                    instance_kernel_method="interpolation_bilinear"):
    C = weight.shape[1]
    if instance_kernel_method == "interpolation_bilinear":
        if conv_type == "H":
            w_inst = _linear_interp_align_corners(weight, 2, H)     # (O, C, H, 1)
        else:
            w_inst = _linear_interp_align_corners(weight, 3, W)     # (O, C, 1, W)
    else:
        w_inst = weight
    if use_pe and pe is not None:
        if instance_kernel_method == "interpolation_bilinear":
            pe_full = _linear_interp_align_corners(
                _linear_interp_align_corners(pe, 2, H), 3, W)       # (1, C, H, W)
        else:
            pe_full = pe
    else:
        pe_full = jnp.zeros((1, C, H, W), dtype)
    return w_inst.astype(jnp.float32), pe_full.astype(dtype)


# ----------------------------------------------------------------------------
# Pallas kernel: one circulant-weight MXU matmul per (o-tile, batch) grid step.
# ----------------------------------------------------------------------------
def _gcc_conv_kernel(x_ref, pe_ref, w_ref, b_ref, o_ref, *, swap_hw,
                     compute_dtype):
    # x_ref / pe_ref : (C, H, W)
    # w_ref          : (o_blk*L, C*L)  circulant weight tile (compute_dtype)
    # b_ref          : (o_blk*L, 1)    f32 bias column
    # o_ref          : (o_blk, H, W)
    C = x_ref.shape[0]
    o_blk = o_ref.shape[0]

    xpe = x_ref[...] + pe_ref[...]                # PE add, once per block
    if swap_hw:                                   # conv_type 'W': slide along W
        xpe = jnp.swapaxes(xpe, 1, 2)             # (C, W, H) in-VMEM transpose
    L, N = xpe.shape[1], xpe.shape[2]

    rhs = xpe.reshape(C * L, N).astype(compute_dtype)
    acc = jnp.dot(w_ref[...], rhs,
                  preferred_element_type=jnp.float32)   # (o_blk*L, N), f32 acc
    acc = acc + b_ref[...]                              # bias, added once
    res = acc.reshape(o_blk, L, N)
    if swap_hw:
        res = jnp.swapaxes(res, 1, 2)                   # back to (o_blk, H, W)
    o_ref[...] = res.astype(o_ref.dtype)


def _gcc_conv_pallas(x, w3, bias, pe_full, swap_hw, compute_dtype,
                     o_block=None):
    B, C, H, W = x.shape
    O, _, L = w3.shape                      # L == W for 'W', == H for 'H'

    # Circulant weight: Wbig[(o, s), (c, j)] = w3[o, c, (j - s) mod L]
    s = jnp.arange(L)
    idx = (s[None, :] - s[:, None]) % L                     # idx[s, j]
    wbig = jnp.transpose(w3[:, :, idx], (0, 2, 1, 3))        # (O, L, C, L)
    wbig = wbig.reshape(O * L, C * L).astype(compute_dtype)

    bias_col = jnp.repeat(bias.astype(jnp.float32), L).reshape(O * L, 1)
    pe3 = pe_full.reshape(C, H, W).astype(x.dtype)

    # Tile the circulant-weight rows so the resident tile stays VMEM-friendly
    # (v7x has 64 MiB physical VMEM vs 128 MiB on v5e/v6e).
    if o_block is None:
        itemsize = np.dtype(compute_dtype).itemsize
        budget = 4 * 1024 * 1024
        o_block = 1
        for d in range(O, 0, -1):
            if O % d == 0 and d * L * C * L * itemsize <= budget:
                o_block = d
                break
    o_tiles = O // o_block

    kernel = functools.partial(_gcc_conv_kernel, swap_hw=swap_hw,
                               compute_dtype=compute_dtype)

    return pl.pallas_call(
        kernel,
        out_shape=jax.ShapeDtypeStruct((B, O, H, W), x.dtype),
        grid_spec=pltpu.PrefetchScalarGridSpec(
            num_scalar_prefetch=0,
            grid=(o_tiles, B),
            in_specs=[
                pl.BlockSpec((None, C, H, W), lambda ot, b: (b, 0, 0, 0)),
                pl.BlockSpec((C, H, W), lambda ot, b: (0, 0, 0)),
                pl.BlockSpec((o_block * L, C * L), lambda ot, b: (ot, 0)),
                pl.BlockSpec((o_block * L, 1), lambda ot, b: (ot, 0)),
            ],
            out_specs=pl.BlockSpec((None, o_block, H, W),
                                   lambda ot, b: (b, ot, 0, 0)),
        ),
        compiler_params=pltpu.CompilerParams(
            dimension_semantics=("parallel", "parallel")),
    )(x, pe3, wbig, bias_col)


def gcc_conv_forward(x, weight, bias, pe, conv_type, use_pe=True,
                     instance_kernel_method="interpolation_bilinear",
                     compute_dtype=jnp.bfloat16, o_block=None):
    """Equivalent of GCC_conv.forward. x: (B, C, H, W) NCHW."""
    B, C, H, W = x.shape
    w_inst, pe_full = _prepare_params(weight, pe, conv_type, H, W, x.dtype,
                                      use_pe, instance_kernel_method)
    O = w_inst.shape[0]
    swap_hw = (conv_type == "W")
    L = W if swap_hw else H
    Lw = w_inst.shape[3] if swap_hw else w_inst.shape[2]
    if Lw != L:
        # TODO(synk): non-interpolated instance kernels with length != H/W change
        # the output spatial size; only the (default) resized-kernel path is supported.
        raise NotImplementedError(
            "GCC_conv Pallas kernel requires the instance kernel length to equal "
            "the spatial extent (instance_kernel_method='interpolation_bilinear' "
            "or global_kernel_size == H/W).")
    w3 = w_inst.reshape(O, C, L)
    return _gcc_conv_pallas(x, w3, bias, pe_full, swap_hw, compute_dtype,
                            o_block)


# ----------------------------------------------------------------------------
# Pure-JAX reference (direct translation of the PyTorch forward) for checking.
# ----------------------------------------------------------------------------
def reference_forward(x, weight, bias, pe, conv_type):
    B, C, H, W = x.shape
    w_inst, pe_full = _prepare_params(weight, pe, conv_type, H, W, x.dtype)
    x = x + pe_full
    if conv_type == "H":
        x_cat = jnp.concatenate([x, x[:, :, :-1, :]], axis=2)
    else:
        x_cat = jnp.concatenate([x, x[:, :, :, :-1]], axis=3)
    out = jax.lax.conv_general_dilated(
        x_cat, w_inst, window_strides=(1, 1), padding="VALID",
        dimension_numbers=("NCHW", "OIHW", "NCHW"))
    return out + bias.reshape(1, -1, 1, 1)


if __name__ == "__main__":
    key = jax.random.PRNGKey(0)
    B, C, H, W = 2, 4, 16, 16
    K = 8  # global_kernel_size != H,W -> exercises the bilinear instance-kernel path

    for i, conv_type in enumerate(("H", "W")):
        kw, kb, kp, kx = jax.random.split(jax.random.fold_in(key, i), 4)
        ks = (K, 1) if conv_type == "H" else (1, K)
        weight = 0.1 * jax.random.normal(kw, (C, C) + ks, jnp.float32)   # Conv2d(dim, dim, ks)
        bias = 0.1 * jax.random.normal(kb, (C,), jnp.float32)
        pe_shape = (1, C, K, 1) if conv_type == "H" else (1, C, 1, K)
        pe = 0.02 * jax.random.normal(kp, pe_shape, jnp.float32)         # trunc_normal std=0.02
        x = jax.random.normal(kx, (B, C, H, W), jnp.float32)

        out = gcc_conv_forward(x, weight, bias, pe, conv_type)
        out = jax.block_until_ready(out)

        ref = reference_forward(x, weight, bias, pe, conv_type)
        np.testing.assert_allclose(np.asarray(out), np.asarray(ref),
                                   rtol=2e-2, atol=2e-2)

    print("KERNEL_OK")
</pallas_src>

<mosaic_0001>
module attributes {stable_mosaic.version = 11 : i64} {
  func.func @_gcc_conv_kernel(%arg0: i32, %arg1: i32, %arg2: memref<1x4x16x16xf32, #tpu.memory_space<vmem>>, %arg3: memref<4x16x16xf32, #tpu.memory_space<vmem>>, %arg4: memref<64x64xbf16, #tpu.memory_space<vmem>>, %arg5: memref<64x1xf32, #tpu.memory_space<vmem>>, %arg6: memref<1x4x16x16xf32, #tpu.memory_space<vmem>>) attributes {dimension_semantics = [#tpu.dimension_semantics<parallel>, #tpu.dimension_semantics<parallel>], iteration_bounds = array<i64: 1, 2>, scalar_prefetch = 0 : i64, scratch_operands = 0 : i64, tpu.core_type = #tpu.core_type<tc>, window_params = [{transform_indices = @transform_0, window_bounds = array<i64: 1, 4, 16, 16>}, {pipeline_mode = #tpu.pipeline_mode<synchronous>, transform_indices = @transform_1, window_bounds = array<i64: 4, 16, 16>}, {transform_indices = @transform_2, window_bounds = array<i64: 64, 64>}, {transform_indices = @transform_3, window_bounds = array<i64: 64, 1>}, {transform_indices = @transform_4, window_bounds = array<i64: 1, 4, 16, 16>}]} {
    %c0 = arith.constant 0 : index
    %c0_0 = arith.constant 0 : index
    %c0_1 = arith.constant 0 : index
    %c0_2 = arith.constant 0 : index
    %0 = vector.load %arg2[%c0, %c0_0, %c0_1, %c0_2] : memref<1x4x16x16xf32, #tpu.memory_space<vmem>>, vector<1x4x16x16xf32>
    %1 = vector.shape_cast %0 : vector<1x4x16x16xf32> to vector<4x16x16xf32>
    %c0_3 = arith.constant 0 : index
    %c0_4 = arith.constant 0 : index
    %c0_5 = arith.constant 0 : index
    %2 = vector.load %arg3[%c0_3, %c0_4, %c0_5] : memref<4x16x16xf32, #tpu.memory_space<vmem>>, vector<4x16x16xf32>
    %3 = arith.addf %1, %2 : vector<4x16x16xf32>
    %4 = vector.shape_cast %3 : vector<4x16x16xf32> to vector<64x16xf32>
    %5 = arith.truncf %4 : vector<64x16xf32> to vector<64x16xbf16>
    %c0_6 = arith.constant 0 : index
    %c0_7 = arith.constant 0 : index
    %6 = vector.load %arg4[%c0_6, %c0_7] : memref<64x64xbf16, #tpu.memory_space<vmem>>, vector<64x64xbf16>
    %cst = arith.constant dense<0.000000e+00> : vector<64x16xf32>
    %7 = tpu.matmul %6, %5, %cst {dimension_numbers = #tpu.dot_dimension_numbers<[1], [0], [0], [1], [0, 0, 1, 1], [], []>} : vector<64x64xbf16>, vector<64x16xbf16>, vector<64x16xf32> -> vector<64x16xf32>
    %c0_8 = arith.constant 0 : index
    %c0_9 = arith.constant 0 : index
    %8 = vector.load %arg5[%c0_8, %c0_9] : memref<64x1xf32, #tpu.memory_space<vmem>>, vector<64x1xf32>
    %9 = vector.broadcast %8 : vector<64x1xf32> to vector<64x16xf32>
    %10 = arith.addf %7, %9 : vector<64x16xf32>
    %11 = vector.shape_cast %10 : vector<64x16xf32> to vector<4x16x16xf32>
    %c0_10 = arith.constant 0 : index
    %c0_11 = arith.constant 0 : index
    %c0_12 = arith.constant 0 : index
    %c0_13 = arith.constant 0 : index
    %12 = vector.load %arg6[%c0_10, %c0_11, %c0_12, %c0_13] : memref<1x4x16x16xf32, #tpu.memory_space<vmem>>, vector<1x4x16x16xf32>
    %13 = vector.shape_cast %12 : vector<1x4x16x16xf32> to vector<4x16x16xf32>
    %14 = vector.shape_cast %11 : vector<4x16x16xf32> to vector<1x4x16x16xf32>
    tpu.vector_store %arg6[%c0_10, %c0_11, %c0_12, %c0_13], %14 {strides = array<i32>} : memref<1x4x16x16xf32, #tpu.memory_space<vmem>>, vector<1x4x16x16xf32>,
    return
  }
  func.func @transform_0(%arg0: i32, %arg1: i32) -> (i32, i32, i32, i32) {
    %c0_i32 = arith.constant 0 : i32
    %c0_i32_0 = arith.constant 0 : i32
    %c0_i32_1 = arith.constant 0 : i32
    %c0_i32_2 = arith.constant 0 : i32
    return %arg1, %c0_i32, %c0_i32_0, %c0_i32_1 : i32, i32, i32, i32
  }
  func.func @transform_1(%arg0: i32, %arg1: i32) -> (i32, i32, i32) {
    %c0_i32 = arith.constant 0 : i32
    %c0_i32_0 = arith.constant 0 : i32
    %c0_i32_1 = arith.constant 0 : i32
    %c0_i32_2 = arith.constant 0 : i32
    return %c0_i32, %c0_i32_0, %c0_i32_1 : i32, i32, i32
  }
  func.func @transform_2(%arg0: i32, %arg1: i32) -> (i32, i32) {
    %c0_i32 = arith.constant 0 : i32
    %c0_i32_0 = arith.constant 0 : i32
    return %arg0, %c0_i32 : i32, i32
  }
  func.func @transform_3(%arg0: i32, %arg1: i32) -> (i32, i32) {
    %c0_i32 = arith.constant 0 : i32
    %c0_i32_0 = arith.constant 0 : i32
    return %arg0, %c0_i32 : i32, i32
  }
  func.func @transform_4(%arg0: i32, %arg1: i32) -> (i32, i32, i32, i32) {
    %c0_i32 = arith.constant 0 : i32
    %c0_i32_0 = arith.constant 0 : i32
    %c0_i32_1 = arith.constant 0 : i32
    return %arg1, %arg0, %c0_i32, %c0_i32_0 : i32, i32, i32, i32
  }
}

</mosaic_0001>

<bundles_post_ra>
// kernel: tpu_custom_call.1
= control target key start
LH: loop header
LB: loop body
LE: loop exit
PB: predicated region body
PF: predicated region fallthrough
CT: control target
= control target key end

     0   :  { %s1163_s0 = inlined_call_operand.hbm [shape: f32[2,4,16,16], index: 0, kind: input, shape index: {}]   ;;  %s1164_s1 = inlined_call_operand.vmem [shape: f32[4,16,16], index: 1, kind: input, shape index: {}]   ;;  %s1165_s2 = inlined_call_operand.hbm [shape: bf16[64,64], index: 2, kind: input, shape index: {}]   ;;  %s1166_s3 = inlined_call_operand.vmem [shape: f32[64,1], index: 3, kind: input, shape index: {}]   ;;  %s1167_s4 = inlined_call_operand.hbm [shape: f32[2,4,16,16], index: 4, kind: output, shape index: {}]  }
   0x1   :  { %1169 = sst [smem:[#allocation11_spill]] %s1165_s2 }
   0x2   :  { %9 = vsyncpa [#allocation3], 0 }
   0x3   :  { %11 = vsyncpa [#allocation3 + $0x1], 0 }
   0x4   :  { %12 = vsyncpa [#allocation6], 0 }
   0x5   :  { %13 = vsyncpa [#allocation4], 0 }
   0x6   :  { %15 = vsyncpa [#allocation4 + $0x1], 0  ;;  %s918_s15 = smov 0   ;;  %s920_s16 = smov 0  }
   0x7   :  { %s922_s17 = smov 0   ;;  %s924_s18 = smov 0  }
   0x8   :  { %s926_s19 = smov 0   ;;  %s928_s20 = smov 0  }
   0x9 LB: > { %s597_s21 = sadd.s32 4294967295, %s881_s20   ;;  %s598_s22 = sadd.s32 4294967294, %s881_s20   ;;  %s881_s20 = sphi %s928_s20, %s21_s20   ;;  %s877_s19 = sphi %s926_s19, %s1187_s19   ;;  %s873_s18 = sphi %s924_s18, %s1186_s18   ;;  %s869_s17 = sphi %s922_s17, %s1185_s17   ;;  %s865_s16 = sphi %s920_s16, %s1184_s16   ;;  %s861_s15 = sphi %s918_s15, %s1183_s15  }
   0xa   : > { %p53_p0 = scmp.ne.s32.totalorder %s865_s16, %s861_s15  ;;  %p952_p1 = scmp.eq.s32.totalorder %s597_s21, 0 }
   0xb   : > { %p956_p2 = scmp.eq.s32.totalorder %s597_s21, 1  ;;  %p158_p3 = scmp.eq.s32.totalorder %s598_s22, 1 }
   0xc   : > { %p962_p4 = por %p952_p1, %p53_p0  ;;  %p599_p5 = scmp.ge.s32.totalorder %s881_s20, 1 }
   0xd   : > { %p967_p6 = por %p158_p3, %p53_p0  ;;  %p165_p7 = scmp.lt.s32.totalorder %s881_s20, 3 }
   0xe   : > { %s1172_s25 = scalar_select %p962_p4, 1, 0 }
   0xf   : > { %s1173_s26 = scalar_select %p967_p6, 1, 0 }
  0x10   : > { %p972_p8 = pnand %p599_p5, %p165_p7  ;;  %s883_s28 = smov [#allocation5]  }
  0x11   : > { %s183_s29 = sshll.u32 %s883_s28, 4  ;;  %s30_s5 = sadd.s32 1, %s877_s19  ;;  %s184_s29 = int_to_ptr.vmem [resolvable:$true] %s183_s29 }
  0x12   : > { %p665_p9 = pneg %p972_p8  ;;  %s754_s6 = scalar_lea.vmem %s184_s29, 512 }
  0x13   : > { %p755_p13 = scmp.ne.s32.totalorder %s184_s29, %s754_s6  ;;  %p762_p5 = scmp.lt.s32.totalorder %s184_s29, %s184_s29 }
  0x14   : > { %p981_p11 = pnand %p665_p9, %p952_p1  ;;  %p763_p7 = scmp.lt.s32.totalorder %s754_s6, %s754_s6 }
  0x16   : > { %p745_p12 = pneg %p981_p11  ;;  %p764_p6 = por %p763_p7, %p762_p5 }
  0x18   : > { %p757_p0 = pnand %p755_p13, %p745_p12 }
  0x1a   : > { %p758_p3 = pneg %p757_p0 }
  0x1c   : > { %p765_p4 = pnand %p764_p6, %p758_p3 }
  0x1e   : > { %768 = shalt.err (!%p765_p4)
}
  0x1f   : > { %s884_s7 = smov 64   ;;  %s885_s8 = smov 4  }
  0x20   : > { %s1176_s2 = sld [smem:[#allocation11_spill]]  ;;  %p31_p6 = scmp.ge.s32.totalorder %s30_s5, 2 }
  0x21   : > { %s40_s11 = sadd.s32 1, %s869_s17  ;;  %p47_p4 = scmp.ne.s32.totalorder %s869_s17, %s865_s16 }
  0x22   : > { %p48_p9 = scmp.eq.s32.totalorder %s881_s20, 0  ;;  %s1189_s5 = smov (%p31_p6, %s30_s5), 0 }
  0x23   : > { %p1005_p13 = por %p956_p2, %p47_p4  ;;  %s37_s14 = ssub.s32 %s877_s19, %s1189_s5 }
  0x24   : > { %p999_p12 = por %p48_p9, %p47_p4  ;;  %p678_p0 = scmp.lt.s32.totalorder %s881_s20, 2 }
  0x25   : > { %s206_s21 = sand.u32 1, %s869_s17  }
  0x26   : > { %668 = dma.hbm_to_vmem [thread:$0]  (!%p981_p11), %s1176_s2, 512, %s184_s29, [#allocation6], %s884_s7, %s884_s7, %s885_s8  }
  0x27   : > { %p38_p11 = scmp.eq.s32.totalorder %s37_s14, 0  ;;  %s603_s22 = sshll.u32 %s206_s21, 6 }
  0x28   : > { %s623_s29 = sshll.u32 %s877_s19, 10  ;;  %s210_s8 = scalar_lea.vmem [#allocation2], %s603_s22 }
  0x29   : > { %s1014_s28 = scalar_select %p38_p11, %s869_s17, %s40_s11  }
  0x2a   : > { %s216_s7 = scalar_lea.hbm %s1163_s0, %s623_s29  ;;  %s217_s9 = sshll.u32 %s210_s8, 4  ;;  %s218_s9 = int_to_ptr.vmem [resolvable:$true] %s217_s9 }
  0x2b   : > { %p1022_p2 = pnand %p678_p0, %p999_p12  ;;  %s207_s10 = scalar_lea.sflag [#allocation3], %s206_s21 }
  0x2c   : > { %s782_s14 = scalar_lea.vmem %s218_s9, 1024  ;;  %s886_s11 = smov [#allocation2]  }
  0x2d   : > { %p771_p3 = pneg %p1022_p2  ;;  %p783_p5 = scmp.ne.s32.totalorder %s218_s9, %s782_s14 }
  0x2e   : > { %s787_s2 = sshll.u32 %s886_s11, 4  ;;  %s788_s2 = int_to_ptr.vmem [resolvable:$false] %s787_s2 }
  0x2f   : > { %p785_p7 = pnand %p783_p5, %p771_p3  ;;  %s789_s29 = scalar_lea.vmem %s788_s2, 2048 }
  0x30   : > { %p790_p4 = scmp.lt.s32.totalorder %s218_s9, %s788_s2  ;;  %p791_p9 = scmp.lt.s32.totalorder %s789_s29, %s782_s14 }
  0x31   : > { %p786_p6 = pneg %p785_p7 }
  0x32   : > { %p792_p11 = por %p791_p9, %p790_p4 }
  0x34   : > { %p793_p10 = pnand %p792_p11, %p786_p6 }
  0x36   : > { %796 = shalt.err (!%p793_p10)
}
  0x37   : > { %s887_s12 = smov 128   ;;  %s888_s22 = smov 8  }
  0x38   : > { %672 = dma.hbm_to_vmem [thread:$0]  (!%p1022_p2), %s216_s7, 1024, %s218_s9, %s207_s10, %s887_s12, %s887_s12, %s888_s22  }
  0x39   : > { %229 = sbr.rel (%p972_p8) target bundleno = 302 (0x12e), region = 36  ;;  %s1033_s21 = sand.u32 (!%p972_p8), 1, %s865_s16  }
  0x3a   : > { %s607_s2 = sshll.u32 (!%p972_p8), %s1033_s21, 6  ;;  %s232_s30 = scalar_lea.sflag (!%p972_p8), [#allocation3], %s1033_s21 }
  0x3b   : > { %s235_s6 = scalar_lea.vmem (!%p972_p8), [#allocation2], %s607_s2  ;;  %p1180_p10 = scmp.ne.s32.totalorder (!%p972_p8), %s1172_s25, 0 }
  0x3e   : > { %848 = dma.done.wait (%p1180_p10), %s232_s30, 1024  }
  0x3f   : > { %850 = vsyncadd (%p1180_p10), %s232_s30, 4294966272 }
  0x40   : > { %852 = dma.done.wait (%p952_p1), [#allocation6], 512  }
  0x41   : > { %854 = vsyncadd (%p952_p1), [#allocation6], 4294966784  ;;  %v889_v0 = vmov 0   ;;  %v284_v1 = vld [vmem:[%s235_s6 + $0x30] sm:$0xff]  ;;  %v285_v2 = vld [vmem:[%s235_s6 + $0x38] sm:$0xff]  ;;  %vm382_vm0 = vcmask 523264  }
  0x42   : > { %738 = vset.pattern.permute.xlu1 %v889_v0  ;;  %737 = vset.pattern.permute.xlu0 %v889_v0  ;;  %v292_v3 = vld [vmem:[%s1164_s1 + $0x30] sm:$0xff]  ;;  %v293_v4 = vld [vmem:[%s1164_s1 + $0x38] sm:$0xff]  ;;  %v282_v6 = vld [vmem:[%s235_s6 + $0x20] sm:$0xff]  ;;  %vm460_vm1 = vcmask 130048   ;;  %s268_s8 = scalar_lea.vmem [#allocation7], %s607_s2  ;;  %s624_s9 = sshll.u32 %s873_s18, 10 }
  0x43   : > { %v300_v5 = vadd.f32 %v292_v3, %v284_v1  ;;  %v283_v7 = vld [vmem:[%s235_s6 + $0x28] sm:$0xff]  ;;  %v301_v8 = vadd.f32 %v293_v4, %v285_v2  ;;  %v290_v9 = vld [vmem:[%s1164_s1 + $0x20] sm:$0xff]  ;;  %v280_v11 = vld [vmem:[%s235_s6 + $0x10] sm:$0xff]  ;;  %s486_s25 = sshll.u32 %s268_s8, 4  ;;  %s1109_s24 = scalar_lea.hbm %s1167_s4, %s624_s9  ;;  %s1111_s25 = int_to_ptr.vmem [resolvable:$true] %s486_s25 }
  0x44   : > { %v291_v10 = vld [vmem:[%s1164_s1 + $0x28] sm:$0xff]  ;;  %v298_v12 = vadd.f32 %v290_v9, %v282_v6  ;;  %v281_v14 = vld [vmem:[%s235_s6 + $0x18] sm:$0xff]  ;;  %v288_v15 = vld [vmem:[%s1164_s1 + $0x10] sm:$0xff]  ;;  %s470_s18 = scalar_lea.sflag [#allocation4], %s1033_s21  ;;  %s797_s10 = scalar_lea.vmem %s1111_s25, 1024 }
  0x45   : > { %v299_v13 = vadd.f32 %v291_v10, %v283_v7  ;;  %v289_v16 = vld [vmem:[%s1164_s1 + $0x18] sm:$0xff]  ;;  %v305_v17 = vpack.c.bf16 %v301_v8, %v300_v5  ;;  %v296_v18 = vadd.f32 %v288_v15, %v280_v11  ;;  %v278_v20 = vld [vmem:[%s235_s6] sm:$0xff]  ;;  %v279_v21 = vld [vmem:[%s235_s6 + $0x8] sm:$0xff]  ;;  %p798_p1 = scmp.ne.s32.totalorder %s1111_s25, %s797_s10  ;;  %s890_s14 = smov [#allocation7]  }
  0x46   : > { %v297_v19 = vadd.f32 %v289_v16, %v281_v14  ;;  %v286_v22 = vld [vmem:[%s1164_s1] sm:$0xff]  ;;  %v287_v24 = vld [vmem:[%s1164_s1 + $0x8] sm:$0xff]  ;;  %v740_v26 = vld [vmem:[#allocation5 + $0x10] sm:$0xff]   ;;  %s801_s11 = sshll.u32 %s890_s14, 4  ;;  %s802_s11 = int_to_ptr.vmem [resolvable:$false] %s801_s11 }
  0x47   : > { %v304_v23 = vpack.c.bf16 %v299_v13, %v298_v12  ;;  %633 = vmatprep.subr.bf16.mxu0 %v305_v17  ;;  %649 = vmatprep.subr.bf16.mxu1 %v305_v17  ;;  %v739_v25 = vld [vmem:[#allocation5] sm:$0xff]   ;;  %v294_v28 = vadd.f32 %v286_v22, %v278_v20  ;;  %v295_v29 = vadd.f32 %v287_v24, %v279_v21  ;;  %v316_v30 = vld [vmem:[%s1166_s3 + $0x10] sm:$0xff]  ;;  %v317_v32 = vld [vmem:[%s1166_s3 + $0x18] sm:$0xff]  ;;  %p799_p8 = pnand %p798_p1, %p1005_p13  ;;  %s803_s29 = scalar_lea.vmem %s802_s11, 2048 }
  0x48   : > { %634 = vmatpush3.bf16.msra.mxu0 %v305_v17  ;;  %653 = vmatpush3.bf16.msra.mxu1 %v305_v17  ;;  %v303_v27 = vpack.c.bf16 %v297_v19, %v296_v18  ;;  %v314_v31 = vld [vmem:[%s1166_s3] sm:$0xff]  ;;  %v315_v33 = vld [vmem:[%s1166_s3 + $0x8] sm:$0xff]  ;;  %v742_v38 = vld [vmem:[#allocation5 + $0x18] sm:$0xff]   ;;  %p804_p0 = scmp.lt.s32.totalorder %s1111_s25, %s802_s11  ;;  %p805_p2 = scmp.lt.s32.totalorder %s803_s29, %s797_s10 }
  0x49   : > { %635 = vmatprep.subr.bf16.mxu0 %v304_v23  ;;  %650 = vmatprep.subr.bf16.mxu1 %v304_v23  ;;  %v302_v34 = vpack.c.bf16 %v295_v29, %v294_v28  ;;  %v319_v35 = vld [vmem:[%s1166_s3 + $0x28] sm:$0xff]  ;;  %v318_v36 = vld [vmem:[%s1166_s3 + $0x20] sm:$0xff]  ;;  %v321_v39 = vld [vmem:[%s1166_s3 + $0x38] sm:$0xff]  ;;  %p800_p12 = pneg %p799_p8 }
  0x4a   : > { %641 = vmatprep.mubr.msk.bf16.mxu0 %vm382_vm0, %v739_v25  ;;  %645 = vmatprep.mubr.msk.bf16.mxu1 %vm382_vm0, %v740_v26  ;;  %v741_v37 = vld [vmem:[#allocation5 + $0x8] sm:$0xff]   ;;  %v320_v40 = vld [vmem:[%s1166_s3 + $0x30] sm:$0xff]  ;;  %p806_p3 = por %p805_p2, %p804_p0 }
  0x4b   : > { %334 = vperm.xlu1 %738, %v316_v30   ;;  %324 = vperm.xlu0 %737, %v314_v31  }
  0x4c   : > { %636 = vmatpush3.bf16.msra.mxu0 %v304_v23  ;;  %654 = vmatpush3.bf16.msra.mxu1 %v304_v23  ;;  %p807_p5 = pnand %p806_p3, %p800_p12 }
  0x4d   : > { %637 = vmatprep.subr.bf16.mxu0 %v303_v27  ;;  %651 = vmatprep.subr.bf16.mxu1 %v303_v27 }
  0x4f   : > { %339 = vperm.xlu1 %738, %v317_v32   ;;  %329 = vperm.xlu0 %737, %v315_v33  }
  0x50   : > { %638 = vmatpush3.bf16.msra.mxu0 %v303_v27  ;;  %655 = vmatpush3.bf16.msra.mxu1 %v303_v27 }
  0x51   : > { %639 = vmatprep.subr.bf16.mxu0 %v302_v34  ;;  %652 = vmatprep.subr.bf16.mxu1 %v302_v34 }
  0x53   : > { %349 = vperm.xlu1 %738, %v319_v35   ;;  %344 = vperm.xlu0 %737, %v318_v36  }
  0x54   : > { %640 = vmatpush3.bf16.msra.mxu0 %v302_v34  ;;  %656 = vmatpush3.bf16.msra.mxu1 %v302_v34 }
  0x57   : > { %642 = vmatmul.mubr.msk.bf16.vlgmr.msra.gmra.mxu0 %vm382_vm0, %v741_v37  ;;  %646 = vmatmul.mubr.msk.bf16.vlgmr.msra.gmra.mxu1 %vm382_vm0, %v742_v38 }
  0x58   : > { %359 = vperm.xlu1 %738, %v321_v39   ;;  %354 = vperm.xlu0 %737, %v320_v40  }
  0xc6   : > { %v325_v41 = vpop.permute.xlu0 %324  ;;  %v335_v42 = vpop.permute.xlu1 %334 }
  0xca   : > { %v330_v43 = vpop.permute.xlu0 %329  ;;  %v340_v44 = vpop.permute.xlu1 %339 }
  0xce   : > { %v345_v45 = vpop.permute.xlu0 %344  ;;  %v350_v46 = vpop.permute.xlu1 %349 }
  0xd3   : > { %v355_v47 = vpop.permute.xlu0 %354  ;;  %v360_v54 = vpop.permute.xlu1 %359 }
 0x117   : > { %v643_v48 = vpop.f32.mrf.mxu0  ;;  %v647_v49 = vpop.f32.mrf.mxu1 }
 0x118   : > { %v438_v50 = vadd.f32 %v643_v48, %v335_v42  ;;  %v454_v51 = vadd.f32 %v647_v49, %v355_v47 }
 0x119   : > { %v429_v52 = vpop.f32.mrf.mxu0  ;;  %v445_v53 = vpop.f32.mrf.mxu1 }
 0x11a   : > { %463 = vst.msk [vmem:[%s268_s8 + $0x10] sm:$0xff] %vm460_vm1, %v438_v50  ;;  %467 = vst.msk [vmem:[%s268_s8 + $0x30] sm:$0xff] %vm460_vm1, %v454_v51  ;;  %v430_v55 = vadd.f32 %v429_v52, %v325_v41  ;;  %v446_v56 = vadd.f32 %v445_v53, %v345_v45 }
 0x11b   : > { %v644_v57 = vpop.f32.mrf.mxu0  ;;  %v648_v58 = vpop.f32.mrf.mxu1 }
 0x11c   : > { %461 = vst.msk [vmem:[%s268_s8] sm:$0xff] %vm460_vm1, %v430_v55  ;;  %465 = vst.msk [vmem:[%s268_s8 + $0x20] sm:$0xff] %vm460_vm1, %v446_v56  ;;  %v441_v59 = vadd.f32 %v644_v57, %v340_v44  ;;  %v457_v60 = vadd.f32 %v648_v58, %v360_v54 }
 0x11d   : > { %v432_v61 = vpop.f32.mrf.mxu0  ;;  %v448_v62 = vpop.f32.mrf.mxu1 }
 0x11e   : > { %464 = vst.msk [vmem:[%s268_s8 + $0x18] sm:$0xff] %vm460_vm1, %v441_v59  ;;  %468 = vst.msk [vmem:[%s268_s8 + $0x38] sm:$0xff] %vm460_vm1, %v457_v60  ;;  %v433_v63 = vadd.f32 %v432_v61, %v330_v43  ;;  %v449_v0 = vadd.f32 %v448_v62, %v350_v46 }
 0x120   : > { %462 = vst.msk [vmem:[%s268_s8 + $0x8] sm:$0xff] %vm460_vm1, %v433_v63  ;;  %466 = vst.msk [vmem:[%s268_s8 + $0x28] sm:$0xff] %vm460_vm1, %v449_v0 }
 0x121   : > { %810 = shalt.err (!%p807_p5)
}
 0x122   : > { %s811_s12 = scalar_lea.hbm %s1109_s24, 1024  ;;  %s815_s27 = scalar_lea.hbm %s1167_s4, 2048 }
 0x123   : > { %p812_p7 = scmp.ne.s32.totalorder %s1109_s24, %s811_s12  ;;  %p816_p9 = scmp.lt.s32.totalorder %s1109_s24, %s1167_s4 }
 0x124   : > { %p817_p11 = scmp.lt.s32.totalorder %s815_s27, %s811_s12 }
 0x125   : > { %p813_p6 = pnand %p812_p7, %p1005_p13 }
 0x126   : > { %p818_p10 = por %p817_p11, %p816_p9 }
 0x127   : > { %p814_p4 = pneg %p813_p6 }
 0x129   : > { %p819_p1 = pnand %p818_p10, %p814_p4 }
 0x12b   : > { %822 = shalt.err (!%p819_p1)
}
 0x12c   : > { %s891_s8 = smov 128   ;;  %s892_s9 = smov 8  }
 0x12d   : > { %663 = dma.vmem_to_hbm [thread:$0]  (%p1005_p13), %s1111_s25, 1024, %s1109_s24, %s470_s18, %s891_s8, %s891_s8, %s892_s9  }
 0x12e PF: > { %s501_s2 = sand.u32 1, %s861_s15   ;;  %p1181_p8 = scmp.ne.s32.totalorder %s1173_s26, 0 }
 0x12f   : > { %p1182_p12 = scmp.ge.s32.totalorder %s881_s20, 2  ;;  %s502_s23 = scalar_lea.sflag [#allocation4], %s501_s2 }
 0x131   : > { %p674_p0 = pnand %p1182_p12, %p1181_p8 }
 0x133   : > { %p675_p2 = pneg %p674_p0 }
 0x135   : > { %856 = dma.done.wait (%p675_p2), %s502_s23, 1024  }
 0x136   : > { %858 = vsyncadd (%p675_p2), %s502_s23, 4294966272  ;;  %s21_s20 = sadd.s32 1, %s881_s20   ;;  %s1183_s15 = smov %s865_s16 }
 0x137   : > { %p18_p3 = scmp.ge.s32.totalorder %s21_s20, 4   ;;  %s1184_s16 = smov %s869_s17 }
 0x138   : > { %s1185_s17 = smov %s1014_s28  ;;  %s1186_s18 = smov %s877_s19 }
 0x139   : > { %s1187_s19 = smov %s1189_s5  ;;  %20 = sbr.rel (!%p18_p3) target bundleno = 9 (0x9), region = 89 }
 0x13e   :  { %507 = vsyncpa [#allocation3], 1 }
 0x13f   :  { %509 = vsyncpa [#allocation3 + $0x1], 1 }
 0x140   :  { %510 = vsyncpa [#allocation6], 1 }
 0x141   :  { %511 = vsyncpa [#allocation4], 1 }
 0x142   :  { %513 = vsyncpa [#allocation4 + $0x1], 1 }

</bundles_post_ra>
